<compile_context>
chip_gen: v6e
topology: v6e:2x2x1
jax: 0.10.0
libtpu: 0.0.40
codegen_flags: <defaults>
</compile_context>

<pallas_src>
import functools
import math

import jax
import jax.numpy as jnp
from jax.experimental import pallas as pl
from jax.experimental.pallas import tpu as pltpu


def _round_up(x, m):
    return ((x + m - 1) // m) * m


def _round_down(x, m):
    return (x // m) * m


def _batch_partial_sum(block, batch):
    """Sum a (rows, emb) f32 tile over time, per batch position.

    Rows are flattened as g = s*batch + b and the tile start is batch-aligned,
    so local row j belongs to batch index j % batch.
    """
    rows, emb_dim = block.shape
    if batch % 8 == 0:
        # Layout-friendly: clean sublane regrouping + vreg adds.
        return block.reshape(rows // batch, batch, emb_dim).sum(axis=0)
    ps = jnp.zeros((batch, emb_dim), jnp.float32)
    for t in range(rows // batch):
        ps = ps + block[t * batch:(t + 1) * batch, :]
    return ps


# ---------------------------------------------------------------------------
# Path A: embedding table resident in VMEM (constant index_map, 1-D grid).
# ---------------------------------------------------------------------------
def _resident_kernel(ids_ref, table_ref, emb_ref, psum_ref,
                     *, tile_r, batch, vocab, emb_dim, vchunk):
    ids = ids_ref[...]                                          # (tile_r, 1) i32
    # Column iota hoisted out of the vocab-chunk loop (computed once per tile).
    col = jax.lax.broadcasted_iota(jnp.int32, (tile_r, vchunk), 1)

    acc = jnp.zeros((tile_r, emb_dim), jnp.float32)
    for c0 in range(0, vocab, vchunk):
        c = min(vchunk, vocab - c0)
        onehot = (col[:, :c] + c0 == ids).astype(table_ref.dtype)
        acc = acc + jnp.dot(onehot, table_ref[c0:c0 + c, :],
                            preferred_element_type=jnp.float32)

    # Dense (tile_r, emb_dim) slab store of the memory bank.
    emb_ref[...] = acc.astype(emb_ref.dtype)
    # Per-batch partial time-sums of this row tile (VALU adds, no 2nd matmul).
    psum_ref[0, :, :] = _batch_partial_sum(acc, batch)


def _choose_resident_tile_r(s_len, batch, n_rows, tile_r_max):
    """Pad-free row tile: tile_r = k*batch with k | s_len, sublane aligned."""
    cands = []
    for k in range(1, s_len + 1):
        if s_len % k:
            continue
        tr = k * batch
        if tr > max(tile_r_max, batch) and tr != n_rows:
            continue
        if tr % 8 == 0 or tr == n_rows:
            cands.append(tr)
    if not cands:
        return None
    # Prefer >= 2 row tiles so both v7x TensorCores get work.
    multi = [t for t in cands if n_rows // t >= 2]
    pool = multi or cands
    return max(pool)


def _mean_encoder_resident(ids_flat, table, tile_r, vchunk, n_rows, batch):
    vocab, emb_dim = table.shape
    n_row_tiles = n_rows // tile_r
    kernel = functools.partial(_resident_kernel, tile_r=tile_r, batch=batch,
                               vocab=vocab, emb_dim=emb_dim, vchunk=vchunk)
    return pl.pallas_call(
        kernel,
        out_shape=(
            jax.ShapeDtypeStruct((n_rows, emb_dim), table.dtype),
            jax.ShapeDtypeStruct((n_row_tiles, batch, emb_dim), jnp.float32),
        ),
        grid_spec=pltpu.PrefetchScalarGridSpec(
            num_scalar_prefetch=0,
            grid=(n_row_tiles,),
            in_specs=[
                pl.BlockSpec((tile_r, 1), lambda r: (r, 0)),          # ids
                # Whole table, constant block index => DMA'd once total.
                pl.BlockSpec((vocab, emb_dim), lambda r: (0, 0)),
            ],
            out_specs=[
                pl.BlockSpec((tile_r, emb_dim), lambda r: (r, 0)),    # emb slab
                pl.BlockSpec((1, batch, emb_dim), lambda r: (r, 0, 0)),
            ],
        ),
        compiler_params=pltpu.CompilerParams(
            dimension_semantics=("parallel",),
            vmem_limit_bytes=32 * 1024 * 1024),
    )(ids_flat, table)


# ---------------------------------------------------------------------------
# Path B: vocab-tiled fallback (reduction over vocab tiles, f32 scratch acc).
# ---------------------------------------------------------------------------
def _tiled_kernel(ids_ref, table_ref, emb_ref, psum_ref, acc_ref,
                  *, tile_r, tile_v, batch):
    v = pl.program_id(1)
    nv = pl.num_programs(1)

    ids = ids_ref[...]                                          # (tile_r, 1) i32
    local = ids - v * tile_v
    col = jax.lax.broadcasted_iota(jnp.int32, (tile_r, tile_v), 1)
    onehot = (col == local).astype(table_ref.dtype)
    partial = jnp.dot(onehot, table_ref[...],
                      preferred_element_type=jnp.float32)

    @pl.when(v == 0)
    def _init():
        acc_ref[...] = partial

    @pl.when(v > 0)
    def _accum():
        acc_ref[...] += partial

    @pl.when(v == nv - 1)
    def _finalize():
        block = acc_ref[...]
        emb_ref[...] = block.astype(emb_ref.dtype)
        psum_ref[0, :, :] = _batch_partial_sum(block, batch)


def _mean_encoder_tiled(ids_flat, table, n_rows, batch, tile_r_max, tile_v_max):
    vocab, emb_dim = table.shape
    unit = 8 * batch // math.gcd(8, batch)                      # lcm(8, batch)
    tile_r = max(unit,
                 _round_down(min(tile_r_max, _round_up(n_rows, unit)), unit))
    n_pad = _round_up(n_rows, tile_r)
    tile_v = max(8, min(_round_down(tile_v_max, 8), _round_up(vocab, 8)))
    vocab_pad = _round_up(vocab, tile_v)

    ids_pad = ids_flat
    if n_pad != n_rows:                                         # pad sentinel -1
        ids_pad = jnp.pad(ids_flat, ((0, n_pad - n_rows), (0, 0)),
                          constant_values=-1)
    table_pad = table
    if vocab_pad != vocab:
        table_pad = jnp.pad(table, ((0, vocab_pad - vocab), (0, 0)))

    n_row_tiles = n_pad // tile_r
    n_vocab_tiles = vocab_pad // tile_v

    kernel = functools.partial(_tiled_kernel, tile_r=tile_r, tile_v=tile_v,
                               batch=batch)
    emb_flat, psum = pl.pallas_call(
        kernel,
        out_shape=(
            jax.ShapeDtypeStruct((n_pad, emb_dim), table.dtype),
            jax.ShapeDtypeStruct((n_row_tiles, batch, emb_dim), jnp.float32),
        ),
        grid_spec=pltpu.PrefetchScalarGridSpec(
            num_scalar_prefetch=0,
            grid=(n_row_tiles, n_vocab_tiles),
            in_specs=[
                pl.BlockSpec((tile_r, 1), lambda r, v: (r, 0)),
                pl.BlockSpec((tile_v, emb_dim), lambda r, v: (v, 0)),
            ],
            out_specs=[
                pl.BlockSpec((tile_r, emb_dim), lambda r, v: (r, 0)),
                pl.BlockSpec((1, batch, emb_dim), lambda r, v: (r, 0, 0)),
            ],
            scratch_shapes=[pltpu.VMEM((tile_r, emb_dim), jnp.float32)],
        ),
        compiler_params=pltpu.CompilerParams(
            dimension_semantics=("parallel", "arbitrary"),
            vmem_limit_bytes=32 * 1024 * 1024),
    )(ids_pad, table_pad)
    return emb_flat[:n_rows], psum


# ---------------------------------------------------------------------------
# MeanEncoder.forward
# ---------------------------------------------------------------------------
def mean_encoder_forward(ids, table, num_layers, *,
                         tile_r_max=1024, tile_v_max=2048,
                         vmem_budget_bytes=20 * 1024 * 1024,
                         force_tiled=False):
    """ids: (s_len, batch) int32; table: (vocab, emb_dim)."""
    s_len, batch = ids.shape
    vocab, emb_dim = table.shape
    n_rows = s_len * batch
    itemsize = table.dtype.itemsize

    ids_flat = ids.reshape(n_rows, 1).astype(jnp.int32)

    tile_r = _choose_resident_tile_r(s_len, batch, n_rows, tile_r_max)
    use_resident = (not force_tiled) and (tile_r is not None)
    if use_resident:
        vchunk = vocab if vocab <= 512 else 512
        est = (2 * vocab * emb_dim * itemsize        # table (double-buffer safe)
               + 2 * tile_r * emb_dim * itemsize     # emb output blocks
               + tile_r * (vchunk + emb_dim) * 4     # one-hot + f32 accumulator
               + 2 * batch * emb_dim * 4             # psum blocks
               + 2 * tile_r * 4)                     # ids blocks
        use_resident = est <= vmem_budget_bytes

    if use_resident:
        emb_flat, psum = _mean_encoder_resident(ids_flat, table, tile_r,
                                                vchunk, n_rows, batch)
    else:
        emb_flat, psum = _mean_encoder_tiled(ids_flat, table, n_rows, batch,
                                             min(tile_r_max, 512), tile_v_max)

    # Memory bank in (s_len, batch, emb_dim) layout (metadata-only reshape).
    emb = emb_flat.reshape(s_len, batch, emb_dim)

    # Tiny final reduction over row tiles + mean normalization in plain JAX.
    mean = (psum.sum(axis=0) * (1.0 / float(s_len))).astype(table.dtype)
    hidden = jnp.broadcast_to(mean[None, :, :], (num_layers, batch, emb_dim))
    # Mirrors the PyTorch module: return ((mean, mean), emb).
    return (hidden, hidden), emb


if __name__ == "__main__":
    S_LEN, BATCH, EMB_DIM, VOCAB, NUM_LAYERS = 8, 8, 128, 32, 2

    key = jax.random.PRNGKey(0)
    k_ids, k_tbl = jax.random.split(key)
    ids = jax.random.randint(k_ids, (S_LEN, BATCH), 0, VOCAB, dtype=jnp.int32)
    table = jax.random.normal(k_tbl, (VOCAB, EMB_DIM), dtype=jnp.float32)

    # Reference in plain JAX.
    ref_emb = table[ids]                            # (s_len, batch, emb_dim)
    ref_mean = ref_emb.mean(axis=0)                 # (batch, emb_dim)
    ref_hidden = jnp.broadcast_to(ref_mean[None], (NUM_LAYERS, BATCH, EMB_DIM))

    # Primary path: VMEM-resident table.
    (hidden_h, hidden_c), emb = mean_encoder_forward(ids, table, NUM_LAYERS)
    jax.block_until_ready((hidden_h, hidden_c, emb))
    assert emb.shape == (S_LEN, BATCH, EMB_DIM)
    assert hidden_h.shape == (NUM_LAYERS, BATCH, EMB_DIM)
    assert jnp.allclose(emb, ref_emb, atol=1e-5)
    assert jnp.allclose(hidden_h, ref_hidden, atol=1e-5)
    assert jnp.allclose(hidden_c, ref_hidden, atol=1e-5)

    # Fallback path (used when the table exceeds the VMEM budget); forced here
    # with small tiles so the 2x2 accumulation grid is exercised too.
    (t_h, t_c), t_emb = mean_encoder_forward(ids, table, NUM_LAYERS,
                                             force_tiled=True,
                                             tile_r_max=32, tile_v_max=16)
    jax.block_until_ready((t_h, t_c, t_emb))
    assert jnp.allclose(t_emb, ref_emb, atol=1e-5)
    assert jnp.allclose(t_h, ref_hidden, atol=1e-5)
    assert jnp.allclose(t_c, ref_hidden, atol=1e-5)

    print("KERNEL_OK")
</pallas_src>

<mosaic_0001>
module attributes {stable_mosaic.version = 11 : i64} {
  func.func @_resident_kernel(%arg0: i32, %arg1: memref<32x1xi32, #tpu.memory_space<vmem>>, %arg2: memref<32x128xf32, #tpu.memory_space<vmem>>, %arg3: memref<32x128xf32, #tpu.memory_space<vmem>>, %arg4: memref<1x8x128xf32, #tpu.memory_space<vmem>>) attributes {dimension_semantics = [#tpu.dimension_semantics<parallel>], iteration_bounds = array<i64: 2>, scalar_prefetch = 0 : i64, scratch_operands = 0 : i64, tpu.core_type = #tpu.core_type<tc>, window_params = [{transform_indices = @transform_0, window_bounds = array<i64: 32, 1>}, {pipeline_mode = #tpu.pipeline_mode<synchronous>, transform_indices = @transform_1, window_bounds = array<i64: 32, 128>}, {transform_indices = @transform_2, window_bounds = array<i64: 32, 128>}, {transform_indices = @transform_3, window_bounds = array<i64: 1, 8, 128>}]} {
    %c0 = arith.constant 0 : index
    %c0_0 = arith.constant 0 : index
    %0 = vector.load %arg1[%c0, %c0_0] : memref<32x1xi32, #tpu.memory_space<vmem>>, vector<32x1xi32>
    %1 = tpu.iota {dimensions = array<i32: 1>} : vector<32x32xi32>
    %cst = arith.constant 0.000000e+00 : f32
    %2 = vector.broadcast %cst : f32 to vector<32x128xf32>
    %c0_i32 = arith.constant 0 : i32
    %3 = vector.broadcast %c0_i32 : i32 to vector<32x32xi32>
    %4 = arith.addi %1, %3 : vector<32x32xi32>
    %5 = vector.broadcast %0 : vector<32x1xi32> to vector<32x32xi32>
    %6 = arith.cmpi eq, %4, %5 : vector<32x32xi32>
    %7 = arith.extui %6 : vector<32x32xi1> to vector<32x32xi32>
    %8 = arith.sitofp %7 : vector<32x32xi32> to vector<32x32xf32>
    %c0_1 = arith.constant 0 : index
    %c0_2 = arith.constant 0 : index
    %9 = vector.load %arg2[%c0_1, %c0_2] : memref<32x128xf32, #tpu.memory_space<vmem>>, vector<32x128xf32>
    %cst_3 = arith.constant dense<0.000000e+00> : vector<32x128xf32>
    %10 = tpu.matmul %8, %9, %cst_3 {dimension_numbers = #tpu.dot_dimension_numbers<[1], [0], [0], [1], [0, 0, 1, 1], [], []>} : vector<32x32xf32>, vector<32x128xf32>, vector<32x128xf32> -> vector<32x128xf32>
    %11 = arith.addf %2, %10 : vector<32x128xf32>
    %c0_4 = arith.constant 0 : index
    %c0_5 = arith.constant 0 : index
    %12 = vector.load %arg3[%c0_4, %c0_5] : memref<32x128xf32, #tpu.memory_space<vmem>>, vector<32x128xf32>
    tpu.vector_store %arg3[%c0_4, %c0_5], %11 {strides = array<i32>} : memref<32x128xf32, #tpu.memory_space<vmem>>, vector<32x128xf32>,
    %13 = vector.shape_cast %11 : vector<32x128xf32> to vector<4x8x128xf32>
    %cst_6 = arith.constant dense<0.000000e+00> : vector<8x128xf32>
    %14 = vector.multi_reduction <add>, %13, %cst_6 [0] : vector<4x8x128xf32> to vector<8x128xf32>
    %c0_7 = arith.constant 0 : index
    %c0_8 = arith.constant 0 : index
    %c0_9 = arith.constant 0 : index
    %15 = vector.load %arg4[%c0_7, %c0_8, %c0_9] : memref<1x8x128xf32, #tpu.memory_space<vmem>>, vector<1x8x128xf32>
    %16 = vector.shape_cast %15 : vector<1x8x128xf32> to vector<8x128xf32>
    %17 = vector.shape_cast %14 : vector<8x128xf32> to vector<1x8x128xf32>
    tpu.vector_store %arg4[%c0_7, %c0_8, %c0_9], %17 {strides = array<i32>} : memref<1x8x128xf32, #tpu.memory_space<vmem>>, vector<1x8x128xf32>,
    return
  }
  func.func @transform_0(%arg0: i32) -> (i32, i32) {
    %c0_i32 = arith.constant 0 : i32
    %c0_i32_0 = arith.constant 0 : i32
    return %arg0, %c0_i32 : i32, i32
  }
  func.func @transform_1(%arg0: i32) -> (i32, i32) {
    %c0_i32 = arith.constant 0 : i32
    %c0_i32_0 = arith.constant 0 : i32
    %c0_i32_1 = arith.constant 0 : i32
    return %c0_i32, %c0_i32_0 : i32, i32
  }
  func.func @transform_2(%arg0: i32) -> (i32, i32) {
    %c0_i32 = arith.constant 0 : i32
    %c0_i32_0 = arith.constant 0 : i32
    return %arg0, %c0_i32 : i32, i32
  }
  func.func @transform_3(%arg0: i32) -> (i32, i32, i32) {
    %c0_i32 = arith.constant 0 : i32
    %c0_i32_0 = arith.constant 0 : i32
    %c0_i32_1 = arith.constant 0 : i32
    return %arg0, %c0_i32, %c0_i32_0 : i32, i32, i32
  }
}

</mosaic_0001>

<bundles_post_ra>
// kernel: tpu_custom_call.1
= control target key start
LH: loop header
LB: loop body
LE: loop exit
PB: predicated region body
PF: predicated region fallthrough
CT: control target
= control target key end

     0   :  { %9 = vsyncpa [#allocation3], 0  ;;  %s813_s0 = inlined_call_operand.vmem [shape: s32[64,1], index: 0, kind: input, shape index: {}]   ;;  %s814_s1 = inlined_call_operand.vmem [shape: f32[32,128], index: 1, kind: input, shape index: {}]   ;;  %s815_s2 = inlined_call_operand.hbm [shape: f32[64,128], index: 2, kind: output, shape index: {0}]   ;;  %s816_s3 = inlined_call_operand.hbm [shape: f32[2,8,128], index: 3, kind: output, shape index: {1}]  }
   0x1   :  { %11 = vsyncpa [#allocation3 + $0x1], 0 }
   0x2   :  { %12 = vsyncpa [#allocation5], 0 }
   0x3   :  { %14 = vsyncpa [#allocation5 + $0x1], 0  ;;  %s671_s12 = smov 0   ;;  %s673_s13 = smov 0  }
   0x4   :  { %s675_s14 = smov 0   ;;  %s677_s15 = smov 0  }
   0x5 LB: > { %s692_s16 = sadd.s32 4294967295, %s643_s15   ;;  %s449_s17 = sadd.s32 4294967294, %s643_s15   ;;  %s643_s15 = sphi %s677_s15, %s822_s15   ;;  %s639_s14 = sphi %s675_s14, %s821_s14   ;;  %s635_s13 = sphi %s673_s13, %s820_s13   ;;  %s631_s12 = sphi %s671_s12, %s819_s12  }
   0x6   : > { %s696_s18 = sadd.s32 1, %s643_s15   ;;  %s74_s19 = sadd.s32 1, %s639_s14 }
   0x7   : > { %s71_s20 = ssub.s32 %s643_s15, %s696_s18  ;;  %p84_p0 = scmp.ne.s32.totalorder %s639_s14, %s635_s13 }
   0x8   : > { %p72_p1 = scmp.eq.s32.totalorder %s71_s20, 0  ;;  %p85_p2 = scmp.eq.s32.totalorder %s692_s16, 1 }
   0x9   : > { %p90_p3 = scmp.ne.s32.totalorder %s635_s13, %s631_s12  ;;  %p91_p4 = scmp.eq.s32.totalorder %s449_s17, 1 }
   0xa   : > { %s707_s21 = scalar_select %p72_p1, %s639_s14, %s74_s19  }
   0xb   : > { %p709_p5 = por %p85_p2, %p84_p0  ;;  %p713_p6 = por %p91_p4, %p90_p3 }
   0xc   : > { %p452_p7 = scmp.ge.s32.totalorder %s643_s15, 1  ;;  %p147_p8 = scmp.lt.s32.totalorder %s643_s15, 3 }
   0xe   : > { %p148_p9 = pnand %p452_p7, %p147_p8 }
   0xf   : > { %s455_s24 = sshll.u32 (!%p148_p9), %s692_s16, 2  ;;  %s736_s10 = sand.u32 (!%p148_p9), 1, %s635_s13  }
  0x10   : > { %151 = sbr.rel (%p148_p9) target bundleno = 390 (0x186), region = 28  ;;  %p177_p10 = scmp.lt.s32.totalorder (!%p148_p9), %s455_s24, 7 }
  0x11   : > { %s453_s11 = sshll.u32 (!%p148_p9), %s736_s10, 5  ;;  %s454_s20 = sshll.u32 (!%p148_p9), %s736_s10, 3 }
  0x12   : > { %s168_s17 = scalar_lea.vmem (!%p148_p9), [#allocation2], %s453_s11  ;;  %s469_s28 = sshll.u32 (!%p148_p9), %s692_s16, 7 }
  0x13   : > { %s342_s19 = sshll.u32 (!%p148_p9), %s168_s17, 4  ;;  %s749_s29 = scalar_lea.vmem (!%p148_p9), [#allocation4], %s454_s20  ;;  %s741_s19 = int_to_ptr.vmem [resolvable:$true] %s342_s19 }
  0x14   : > { %s358_s30 = sshll.u32 (!%p148_p9), %s749_s29, 4  ;;  %s553_s5 = scalar_lea.vmem (!%p148_p9), %s741_s19, 512  ;;  %s359_s30 = int_to_ptr.vmem [resolvable:$true] %s358_s30 }
  0x15   : > { %v216_v0 = vld [vmem:[%s814_s1 + $0x18] sm:$0xff]  ;;  %v645_v1 = vmov 0   ;;  %s824_s24 = smov (!%p177_p10, %s455_s24), 7  ;;  %v215_v2 = vld [vmem:[%s814_s1 + $0x10] sm:$0xff]  ;;  %v214_v3 = vld [vmem:[%s814_s1 + $0x8] sm:$0xff]  ;;  %v187_v9 = vlaneseq  ;;  %vm217_vm0 = vcmask 261120   ;;  %p554_p11 = scmp.ne.s32.totalorder %s741_s19, %s553_s5 }
  0x16   : > { %552 = vset.pattern.permute.xlu1 %v645_v1  ;;  %551 = vset.pattern.permute.xlu0 %v645_v1  ;;  %s456_s4 = sshll.u32 %s824_s24, 3  ;;  %v213_v6 = vld [vmem:[%s814_s1] sm:$0xff]  ;;  %v646_v13 = vmov 0.0   ;;  %s472_s24 = sshll.u32 %s692_s16, 9 }
  0x17   : > { %481 = vmatprep.subr.mxu0 %v216_v0  ;;  %495 = vmatprep.subr.mxu1 %v216_v0  ;;  %s180_s7 = scalar_lea.vmem %s813_s0, %s456_s4  ;;  %v188_v10 = vand.u32 127, %v187_v9  ;;  %s746_s27 = scalar_lea.hbm %s815_s2, %s472_s24 }
  0x18   : > { %482 = vmatpush3.msra.mxu0 %v216_v0  ;;  %499 = vmatpush3.msra.mxu1 %v216_v0  ;;  %v185_v4 = vld [vmem:[%s180_s7 + $0x10] sm:$0xff]  ;;  %v183_v5 = vld [vmem:[%s180_s7] sm:$0xff]  ;;  %v186_v7 = vld [vmem:[%s180_s7 + $0x18] sm:$0xff]  ;;  %s324_s4 = scalar_lea.sflag [#allocation3], %s736_s10  ;;  %p555_p12 = pnand %p554_p11, %p709_p5 }
  0x19   : > { %483 = vmatprep.subr.mxu0 %v215_v2  ;;  %496 = vmatprep.subr.mxu1 %v215_v2  ;;  %v184_v8 = vld [vmem:[%s180_s7 + $0x8] sm:$0xff]  ;;  %s647_s6 = smov [#allocation2]  }
  0x1a   : > { %484 = vmatpush3.msra.mxu0 %v215_v2  ;;  %500 = vmatpush3.msra.mxu1 %v215_v2  ;;  %p556_p13 = pneg %p555_p12  ;;  %s557_s7 = sshll.u32 %s647_s6, 4  ;;  %s558_s7 = int_to_ptr.vmem [resolvable:$false] %s557_s7 }
  0x1b   : > { %485 = vmatprep.subr.mxu0 %v214_v3  ;;  %497 = vmatprep.subr.mxu1 %v214_v3  ;;  %s559_s8 = scalar_lea.vmem %s558_s7, 1024  ;;  %p560_p0 = scmp.lt.s32.totalorder %s741_s19, %s558_s7 }
  0x1c   : > { %486 = vmatpush3.msra.mxu0 %v214_v3  ;;  %501 = vmatpush3.msra.mxu1 %v214_v3  ;;  %p561_p1 = scmp.lt.s32.totalorder %s559_s8, %s553_s5 }
  0x1d   : > { %196 = vperm.xlu1 %552, %v185_v4   ;;  %190 = vperm.xlu0 %551, %v183_v5  }
  0x1e   : > { %487 = vmatprep.subr.mxu0 %v213_v6  ;;  %498 = vmatprep.subr.mxu1 %v213_v6  ;;  %p562_p2 = por %p561_p1, %p560_p0 }
  0x1f   : > { %488 = vmatpush3.msra.mxu0 %v213_v6  ;;  %502 = vmatpush3.msra.mxu1 %v213_v6 }
  0x20   : > { %p563_p3 = pnand %p562_p2, %p556_p13 }
  0x21   : > { %199 = vperm.xlu1 %552, %v186_v7   ;;  %193 = vperm.xlu0 %551, %v184_v8  }
  0x98   : > { %v197_v11 = vpop.permute.xlu1 %196  ;;  %v191_v12 = vpop.permute.xlu0 %190 }
  0x99   : > { %vm203_vm1 = vcmp.eq.s32.totalorder %v188_v10, %v197_v11  ;;  %vm201_vm2 = vcmp.eq.s32.totalorder %v188_v10, %v191_v12 }
  0x9a   : > { %v457_v14 = vsel %vm201_vm2, 1.0, %v646_v13  ;;  %v459_v15 = vsel %vm203_vm1, 1.0, %v646_v13 }
  0x9b   : > { %489 = vmatprep.mubr.msk.f32.mxu0 %vm217_vm0, %v457_v14  ;;  %492 = vmatprep.mubr.msk.f32.mxu1 %vm217_vm0, %v459_v15 }
  0x9c   : > { %v200_v16 = vpop.permute.xlu1 %199  ;;  %v194_v17 = vpop.permute.xlu0 %193 }
  0x9d   : > { %vm204_vm3 = vcmp.eq.s32.totalorder %v188_v10, %v200_v16  ;;  %vm202_vm4 = vcmp.eq.s32.totalorder %v188_v10, %v194_v17 }
  0x9e   : > { %v460_v18 = vsel %vm204_vm3, 1.0, %v646_v13  ;;  %v458_v19 = vsel %vm202_vm4, 1.0, %v646_v13 }
  0x9f   : > { %490 = vmatmul.mubr.msk.f32.vlgmr.msra.gmra.mxu0 %vm217_vm0, %v458_v19  ;;  %493 = vmatmul.mubr.msk.f32.vlgmr.msra.gmra.mxu1 %vm217_vm0, %v460_v18 }
 0x15f   : > { %v491_v20 = vpop.f32.mrf.mxu0  ;;  %v494_v21 = vpop.f32.mrf.mxu1 }
 0x160   : > { %316 = vst [vmem:[%s168_s17 + $0x8] sm:$0xff] %v491_v20  ;;  %318 = vst [vmem:[%s168_s17 + $0x18] sm:$0xff] %v494_v21 }
 0x161   : > { %v296_v22 = vpop.f32.mrf.mxu0  ;;  %v306_v23 = vpop.f32.mrf.mxu1 }
 0x162   : > { %315 = vst [vmem:[%s168_s17] sm:$0xff] %v296_v22  ;;  %v319_v24 = vadd.f32 %v491_v20, %v296_v22  ;;  %317 = vst [vmem:[%s168_s17 + $0x10] sm:$0xff] %v306_v23 }
 0x163   : > { %566 = shalt.err (!%p563_p3)
}
 0x164   : > { %s567_s9 = scalar_lea.hbm %s746_s27, 512  ;;  %s571_s20 = scalar_lea.hbm %s815_s2, 1024 }
 0x165   : > { %p568_p4 = scmp.ne.s32.totalorder %s746_s27, %s567_s9  ;;  %p572_p9 = scmp.lt.s32.totalorder %s746_s27, %s815_s2 }
 0x166   : > { %p573_p10 = scmp.lt.s32.totalorder %s571_s20, %s567_s9 }
 0x167   : > { %p569_p7 = pnand %p568_p4, %p709_p5 }
 0x168   : > { %p574_p11 = por %p573_p10, %p572_p9 }
 0x169   : > { %p570_p8 = pneg %p569_p7 }
 0x16b   : > { %p575_p12 = pnand %p574_p11, %p570_p8 }
 0x16d   : > { %578 = shalt.err (!%p575_p12)
}
 0x16e   : > { %s648_s26 = smov 128   ;;  %s649_s5 = smov 8   ;;  %v320_v25 = vadd.f32 %v319_v24, %v306_v23 }
 0x16f   : > { %503 = dma.vmem_to_hbm [thread:$0]  (%p709_p5), %s741_s19, 512, %s746_s27, %s324_s4, %s648_s26, %s648_s26, %s649_s5  }
 0x170   : > { %v321_v26 = vadd.f32 %v494_v21, %v320_v25  ;;  %s356_s8 = scalar_lea.hbm %s816_s3, %s469_s28  ;;  %s329_s9 = scalar_lea.sflag [#allocation5], %s736_s10 }
 0x171   : > { %s579_s11 = scalar_lea.vmem %s359_s30, 128  ;;  %s650_s17 = smov [#allocation4]  }
 0x172   : > { %322 = vst [vmem:[%s749_s29] sm:$0xff] %v321_v26  ;;  %p580_p13 = scmp.ne.s32.totalorder %s359_s30, %s579_s11  ;;  %s583_s20 = sshll.u32 %s650_s17, 4  ;;  %s584_s20 = int_to_ptr.vmem [resolvable:$false] %s583_s20 }
 0x173   : > { %s585_s19 = scalar_lea.vmem %s584_s20, 256  ;;  %p586_p2 = scmp.lt.s32.totalorder %s359_s30, %s584_s20 }
 0x174   : > { %p581_p0 = pnand %p580_p13, %p709_p5  ;;  %p587_p3 = scmp.lt.s32.totalorder %s585_s19, %s579_s11 }
 0x176   : > { %p582_p1 = pneg %p581_p0  ;;  %p588_p4 = por %p587_p3, %p586_p2 }
 0x178   : > { %p589_p7 = pnand %p588_p4, %p582_p1 }
 0x17a   : > { %592 = shalt.err (!%p589_p7)
}
 0x17b   : > { %s593_s16 = scalar_lea.hbm %s356_s8, 128  ;;  %s597_s28 = scalar_lea.hbm %s816_s3, 256 }
 0x17c   : > { %p594_p8 = scmp.ne.s32.totalorder %s356_s8, %s593_s16  ;;  %p598_p11 = scmp.lt.s32.totalorder %s356_s8, %s816_s3 }
 0x17d   : > { %p599_p12 = scmp.lt.s32.totalorder %s597_s28, %s593_s16 }
 0x17e   : > { %p595_p9 = pnand %p594_p8, %p709_p5 }
 0x17f   : > { %p600_p13 = por %p599_p12, %p598_p11 }
 0x180   : > { %p596_p10 = pneg %p595_p9 }
 0x182   : > { %p601_p0 = pnand %p600_p13, %p596_p10 }
 0x184   : > { %604 = shalt.err (!%p601_p0)
}
 0x185   : > { %504 = dma.vmem_to_hbm [thread:$0]  (%p709_p5), %s359_s30, 128, %s356_s8, %s329_s9  }
 0x186 PF: > { %p514_p1 = scmp.ge.s32.totalorder %s643_s15, 2  ;;  %s370_s24 = sand.u32 1, %s631_s12  }
 0x187   : > { %s371_s25 = scalar_lea.sflag [#allocation3], %s370_s24 }
 0x188   : > { %p508_p2 = pnand %p514_p1, %p713_p6 }
 0x18a   : > { %p509_p3 = pneg %p508_p2 }
 0x18c   : > { %622 = dma.done.wait (%p509_p3), %s371_s25, 512  }
 0x18d   : > { %624 = vsyncadd (%p509_p3), %s371_s25, 4294966784  ;;  %s380_s26 = scalar_lea.sflag [#allocation5], %s370_s24 }
 0x18e   : > { %626 = dma.done.wait (%p509_p3), %s380_s26, 128  }
 0x18f   : > { %628 = vsyncadd (%p509_p3), %s380_s26, 4294967168  ;;  %p17_p5 = scmp.ge.s32.totalorder %s696_s18, 4   ;;  %s819_s12 = smov %s635_s13 }
 0x190   : > { %s820_s13 = smov %s639_s14  ;;  %s821_s14 = smov %s707_s21 }
 0x191   : > { %s822_s15 = smov %s696_s18  ;;  %19 = sbr.rel (!%p17_p5) target bundleno = 5 (0x5), region = 80 }
 0x196   :  { %385 = vsyncpa [#allocation3], 1 }
 0x197   :  { %387 = vsyncpa [#allocation3 + $0x1], 1 }
 0x198   :  { %388 = vsyncpa [#allocation5], 1 }
 0x199   :  { %390 = vsyncpa [#allocation5 + $0x1], 1 }

</bundles_post_ra>
